<compile_context>
chip_gen: v5e
topology: v5e:2x2
jax: 0.10.0
libtpu: 0.0.40
codegen_flags: <defaults>
</compile_context>

<pallas_src>
import math

import jax
import jax.numpy as jnp
from jax import lax
from jax.experimental import pallas as pl
from jax.experimental.pallas import tpu as pltpu

BN_EPS = 1e-5
VMEM_LIMIT = 32 * 1024 * 1024


# ---------------------------------------------------------------------------
# Kernel 1: fused QKV projection   qkv = x @ [Wq | Wk | Wv]
# ---------------------------------------------------------------------------
def _qkv_proj_kernel(x_ref, w_ref, o_ref):
    o_ref[...] = jnp.dot(x_ref[...], w_ref[...], preferred_element_type=jnp.float32)


def qkv_proj_pallas(x, w_qkv):
    B, S, D = x.shape
    D3 = w_qkv.shape[1]
    return pl.pallas_call(
        _qkv_proj_kernel,
        out_shape=jax.ShapeDtypeStruct((B, S, D3), jnp.float32),
        grid=(B,),
        in_specs=[
            pl.BlockSpec((None, S, D), lambda b: (b, 0, 0)),
            pl.BlockSpec((D, D3), lambda b: (0, 0)),
        ],
        out_specs=pl.BlockSpec((None, S, D3), lambda b: (b, 0, 0)),
        compiler_params=pltpu.CompilerParams(
            dimension_semantics=("parallel",),
            vmem_limit_bytes=VMEM_LIMIT,
        ),
    )(x, w_qkv)


# ---------------------------------------------------------------------------
# Kernel 2: per-(batch, head) attention + head-combine + residual.
#   Output block is revisited across the head axis -> accumulator pattern.
# ---------------------------------------------------------------------------
def _attn_combine_kernel(x_ref, q_ref, k_ref, v_ref, wc_ref, bc_ref, o_ref):
    h = pl.program_id(1)

    @pl.when(h == 0)
    def _():
        # residual + combine bias, added exactly once per batch row-block
        o_ref[...] = x_ref[...] + bc_ref[...]

    q = q_ref[...]                                           # [S, Dh]
    k = k_ref[...]                                           # [S, Dh]
    v = v_ref[...]                                           # [S, Dh]
    dh = q.shape[-1]

    # scores = q @ k^T / sqrt(Dh)   (contraction over Dh, no explicit transpose)
    s = lax.dot_general(q, k, (((1,), (1,)), ((), ())),
                        preferred_element_type=jnp.float32) * (1.0 / math.sqrt(dh))
    s = s - jnp.max(s, axis=-1, keepdims=True)
    p = jnp.exp(s)
    p = p * pl.reciprocal(jnp.sum(p, axis=-1, keepdims=True), approx=True)

    o_h = jnp.dot(p, v, preferred_element_type=jnp.float32)  # [S, Dh]
    # head-combine slice of Wo folded in here; accumulate into the resident output block
    o_ref[...] += jnp.dot(o_h, wc_ref[...], preferred_element_type=jnp.float32)


def attn_combine_pallas(x, q, k, v, wc_heads, bc):
    B, S, D = x.shape
    _, H, _, Dh = q.shape
    qkv_spec = pl.BlockSpec((None, None, S, Dh), lambda b, h: (b, h, 0, 0))
    return pl.pallas_call(
        _attn_combine_kernel,
        out_shape=jax.ShapeDtypeStruct((B, S, D), jnp.float32),
        grid=(B, H),
        in_specs=[
            pl.BlockSpec((None, S, D), lambda b, h: (b, 0, 0)),
            qkv_spec, qkv_spec, qkv_spec,
            pl.BlockSpec((None, Dh, D), lambda b, h: (h, 0, 0)),
            pl.BlockSpec((1, D), lambda b, h: (0, 0)),
        ],
        out_specs=pl.BlockSpec((None, S, D), lambda b, h: (b, 0, 0)),
        compiler_params=pltpu.CompilerParams(
            dimension_semantics=("parallel", "arbitrary"),
            vmem_limit_bytes=VMEM_LIMIT,
        ),
    )(x, q, k, v, wc_heads, bc)


# ---------------------------------------------------------------------------
# Kernel 3: BN1 -> feed_forward (+residual) -> BN2   (training-mode batch stats)
# ---------------------------------------------------------------------------
def _bn_ffn_kernel(y_ref, g1_ref, b1_ref, w1_ref, fb1_ref, w2_ref, fb2_ref,
                   g2_ref, b2_ref, o_ref):
    y = y_ref[...]                                           # [N, D]
    inv_n = 1.0 / y.shape[0]

    # BatchNorm1d #1: one-pass stats, precomputed per-feature scale/shift
    mu1 = jnp.sum(y, axis=0, keepdims=True) * inv_n
    var1 = jnp.sum(y * y, axis=0, keepdims=True) * inv_n - mu1 * mu1
    sc1 = g1_ref[...] * lax.rsqrt(var1 + BN_EPS)
    h = y * sc1 + (b1_ref[...] - mu1 * sc1)

    # feed_forward: Linear(D,4D) -> ReLU -> Linear(4D,D), plus residual
    mid = jnp.maximum(
        jnp.dot(h, w1_ref[...], preferred_element_type=jnp.float32) + fb1_ref[...], 0.0)
    h2 = h + jnp.dot(mid, w2_ref[...], preferred_element_type=jnp.float32) + fb2_ref[...]

    # BatchNorm1d #2
    mu2 = jnp.sum(h2, axis=0, keepdims=True) * inv_n
    var2 = jnp.sum(h2 * h2, axis=0, keepdims=True) * inv_n - mu2 * mu2
    sc2 = g2_ref[...] * lax.rsqrt(var2 + BN_EPS)
    o_ref[...] = h2 * sc2 + (b2_ref[...] - mu2 * sc2)


def bn_ffn_pallas(y2d, g1, b1, w1, fb1, w2, fb2, g2, b2):
    N, D = y2d.shape
    vmem = pl.BlockSpec(memory_space=pltpu.MemorySpace.VMEM)
    return pl.pallas_call(
        _bn_ffn_kernel,
        out_shape=jax.ShapeDtypeStruct((N, D), jnp.float32),
        in_specs=[vmem] * 9,
        out_specs=vmem,
        compiler_params=pltpu.CompilerParams(vmem_limit_bytes=VMEM_LIMIT),
    )(y2d, g1, b1, w1, fb1, w2, fb2, g2, b2)


# ---------------------------------------------------------------------------
# Full layer forward.
# ---------------------------------------------------------------------------
def mha_encoder_layer_forward(x, params, n_heads):
    B, S, D = x.shape
    Dh = D // n_heads

    w_qkv = jnp.concatenate([params["wq"], params["wk"], params["wv"]], axis=1)  # [D, 3D]
    qkv = qkv_proj_pallas(x, w_qkv)                                              # [B, S, 3D]

    # utils.make_heads equivalent (layout plumbing in XLA): -> q, k, v [B, H, S, Dh]
    qkv = qkv.reshape(B, S, 3, n_heads, Dh).transpose(2, 0, 3, 1, 4)
    q, k, v = qkv[0], qkv[1], qkv[2]

    wc_heads = params["wc"].reshape(n_heads, Dh, D)           # per-head slabs of Wo
    y = attn_combine_pallas(x, q, k, v, wc_heads, params["bc"].reshape(1, D))

    out = bn_ffn_pallas(
        y.reshape(B * S, D),
        params["g1"].reshape(1, D), params["beta1"].reshape(1, D),
        params["w1"], params["b1"].reshape(1, -1),
        params["w2"], params["b2"].reshape(1, D),
        params["g2"].reshape(1, D), params["beta2"].reshape(1, D),
    )
    return out.reshape(B, S, D)


# ---------------------------------------------------------------------------
# Parameter init (mimics torch.nn.Linear / BatchNorm1d defaults), weights in (in, out) layout.
# ---------------------------------------------------------------------------
def _linear_init(key, din, dout, bias=True):
    kw, kb = jax.random.split(key)
    bound = 1.0 / math.sqrt(din)
    w = jax.random.uniform(kw, (din, dout), jnp.float32, -bound, bound)
    if not bias:
        return w
    b = jax.random.uniform(kb, (dout,), jnp.float32, -bound, bound)
    return w, b


def init_params(key, d, n_heads):
    del n_heads
    ks = jax.random.split(key, 6)
    wq = _linear_init(ks[0], d, d, bias=False)
    wk = _linear_init(ks[1], d, d, bias=False)
    wv = _linear_init(ks[2], d, d, bias=False)
    wc, bc = _linear_init(ks[3], d, d)
    w1, b1 = _linear_init(ks[4], d, 4 * d)
    w2, b2 = _linear_init(ks[5], 4 * d, d)
    return dict(
        wq=wq, wk=wk, wv=wv, wc=wc, bc=bc,
        w1=w1, b1=b1, w2=w2, b2=b2,
        g1=jnp.ones((d,), jnp.float32), beta1=jnp.zeros((d,), jnp.float32),
        g2=jnp.ones((d,), jnp.float32), beta2=jnp.zeros((d,), jnp.float32),
    )


# ---------------------------------------------------------------------------
# Pure-JAX reference (mirrors the PyTorch forward in .train() mode).
# ---------------------------------------------------------------------------
def reference_forward(x, params, n_heads):
    B, S, D = x.shape
    Dh = D // n_heads

    def make_heads(t):
        return t.reshape(B, S, n_heads, Dh).transpose(0, 2, 1, 3)   # [B, H, S, Dh]

    q = make_heads(x @ params["wq"])
    k = make_heads(x @ params["wk"])
    v = make_heads(x @ params["wv"])
    s = jnp.einsum("bhqd,bhkd->bhqk", q, k) / math.sqrt(Dh)
    p = jax.nn.softmax(s, axis=-1)
    att = jnp.einsum("bhqk,bhkd->bhqd", p, v).transpose(0, 2, 1, 3).reshape(B, S, D)
    y = x + att @ params["wc"] + params["bc"]

    def bn(t, g, b):
        t2 = t.reshape(-1, D)
        mu = t2.mean(axis=0)
        var = t2.var(axis=0)   # biased, as in train-mode BatchNorm1d normalization
        return ((t2 - mu) / jnp.sqrt(var + BN_EPS) * g + b).reshape(B, S, D)

    y = bn(y, params["g1"], params["beta1"])
    ff = jnp.maximum(y @ params["w1"] + params["b1"], 0.0) @ params["w2"] + params["b2"]
    return bn(y + ff, params["g2"], params["beta2"])


if __name__ == "__main__":
    B, S, D, H = 2, 16, 128, 8        # batch=2, seq=16, embedding_dim=128, n_heads=8

    key = jax.random.PRNGKey(0)
    kx, kp = jax.random.split(key)
    x = jax.random.normal(kx, (B, S, D), jnp.float32)
    params = init_params(kp, D, H)

    out = mha_encoder_layer_forward(x, params, H)
    out = jax.block_until_ready(out)
    assert out.shape == (B, S, D), out.shape
    assert bool(jnp.all(jnp.isfinite(out)))

    ref = reference_forward(x, params, H)
    err = float(jnp.max(jnp.abs(out - ref)))
    assert err < 5e-2, f"max abs error vs reference: {err}"

    print("KERNEL_OK")
</pallas_src>

<mosaic_0001>
module attributes {stable_mosaic.version = 11 : i64} {
  func.func @_qkv_proj_kernel(%arg0: i32, %arg1: memref<1x16x128xf32, #tpu.memory_space<vmem>>, %arg2: memref<128x384xf32, #tpu.memory_space<vmem>>, %arg3: memref<1x16x384xf32, #tpu.memory_space<vmem>>) attributes {dimension_semantics = [#tpu.dimension_semantics<parallel>], iteration_bounds = array<i64: 2>, scalar_prefetch = 0 : i64, scratch_operands = 0 : i64, tpu.core_type = #tpu.core_type<tc>, window_params = [{transform_indices = @transform_0, window_bounds = array<i64: 1, 16, 128>}, {pipeline_mode = #tpu.pipeline_mode<synchronous>, transform_indices = @transform_1, window_bounds = array<i64: 128, 384>}, {transform_indices = @transform_2, window_bounds = array<i64: 1, 16, 384>}]} {
    %c0 = arith.constant 0 : index
    %c0_0 = arith.constant 0 : index
    %c0_1 = arith.constant 0 : index
    %0 = vector.load %arg1[%c0, %c0_0, %c0_1] : memref<1x16x128xf32, #tpu.memory_space<vmem>>, vector<1x16x128xf32>
    %1 = vector.shape_cast %0 : vector<1x16x128xf32> to vector<16x128xf32>
    %c0_2 = arith.constant 0 : index
    %c0_3 = arith.constant 0 : index
    %2 = vector.load %arg2[%c0_2, %c0_3] : memref<128x384xf32, #tpu.memory_space<vmem>>, vector<128x384xf32>
    %cst = arith.constant dense<0.000000e+00> : vector<16x384xf32>
    %3 = tpu.matmul %1, %2, %cst {dimension_numbers = #tpu.dot_dimension_numbers<[1], [0], [0], [1], [0, 0, 1, 1], [], []>} : vector<16x128xf32>, vector<128x384xf32>, vector<16x384xf32> -> vector<16x384xf32>
    %c0_4 = arith.constant 0 : index
    %c0_5 = arith.constant 0 : index
    %c0_6 = arith.constant 0 : index
    %4 = vector.load %arg3[%c0_4, %c0_5, %c0_6] : memref<1x16x384xf32, #tpu.memory_space<vmem>>, vector<1x16x384xf32>
    %5 = vector.shape_cast %4 : vector<1x16x384xf32> to vector<16x384xf32>
    %6 = vector.shape_cast %3 : vector<16x384xf32> to vector<1x16x384xf32>
    tpu.vector_store %arg3[%c0_4, %c0_5, %c0_6], %6 {strides = array<i32>} : memref<1x16x384xf32, #tpu.memory_space<vmem>>, vector<1x16x384xf32>,
    return
  }
  func.func @transform_0(%arg0: i32) -> (i32, i32, i32) {
    %c0_i32 = arith.constant 0 : i32
    %c0_i32_0 = arith.constant 0 : i32
    %c0_i32_1 = arith.constant 0 : i32
    return %arg0, %c0_i32, %c0_i32_0 : i32, i32, i32
  }
  func.func @transform_1(%arg0: i32) -> (i32, i32) {
    %c0_i32 = arith.constant 0 : i32
    %c0_i32_0 = arith.constant 0 : i32
    %c0_i32_1 = arith.constant 0 : i32
    return %c0_i32, %c0_i32_0 : i32, i32
  }
  func.func @transform_2(%arg0: i32) -> (i32, i32, i32) {
    %c0_i32 = arith.constant 0 : i32
    %c0_i32_0 = arith.constant 0 : i32
    %c0_i32_1 = arith.constant 0 : i32
    return %arg0, %c0_i32, %c0_i32_0 : i32, i32, i32
  }
}

</mosaic_0001>

<bundles_post_ra>
// kernel: tpu_custom_call.1
= control target key start
LH: loop header
LB: loop body
LE: loop exit
PB: predicated region body
PF: predicated region fallthrough
CT: control target
= control target key end

     0   :  { %7 = vsyncpa [#allocation3], 0  ;;  %s799_s0 = inlined_call_operand.hbm [shape: f32[2,16,128], index: 0, kind: input, shape index: {}]   ;;  %s800_s1 = inlined_call_operand.hbm [shape: f32[128,384], index: 1, kind: input, shape index: {}]   ;;  %s801_s2 = inlined_call_operand.hbm [shape: f32[2,16,384], index: 2, kind: output, shape index: {}]  }
   0x1   :  { %9 = vsyncpa [#allocation3 + $0x1], 0 }
   0x2   :  { %10 = vsyncpa [#allocation6], 0 }
   0x3   :  { %11 = vsyncpa [#allocation4], 0 }
   0x4   :  { %13 = vsyncpa [#allocation4 + $0x1], 0  ;;  %s654_s9 = smov 0   ;;  %s656_s10 = smov 0  }
   0x5   :  { %s658_s11 = smov 0   ;;  %s660_s12 = smov 0  }
   0x6 LB: > { %s675_s13 = sadd.s32 4294967295, %s630_s12   ;;  %s405_s14 = sadd.s32 4294967294, %s630_s12   ;;  %s630_s12 = sphi %s660_s12, %s811_s12   ;;  %s626_s11 = sphi %s658_s11, %s810_s11   ;;  %s622_s10 = sphi %s656_s10, %s809_s10   ;;  %s618_s9 = sphi %s654_s9, %s808_s9  }
   0x7   : > { %p39_p0 = scmp.ne.s32.totalorder %s622_s10, %s618_s9  ;;  %p40_p1 = scmp.eq.s32.totalorder %s675_s13, 0 }
   0x8   : > { %p84_p2 = scmp.eq.s32.totalorder %s675_s13, 1  ;;  %p90_p3 = scmp.eq.s32.totalorder %s405_s14, 1 }
   0x9   : > { %p684_p4 = por %p40_p1, %p39_p0  ;;  %p406_p5 = scmp.ge.s32.totalorder %s630_s12, 1 }
   0xa   : > { %p689_p6 = por %p90_p3, %p39_p0  ;;  %p97_p7 = scmp.lt.s32.totalorder %s630_s12, 3 }
   0xb   : > { %s108_s19 = sshll.u32 %s800_s1, 4  ;;  %s632_s21 = smov [#allocation5]   ;;  %s109_s19 = int_to_ptr.hbm [resolvable:$true] %s108_s19 }
   0xc   : > { %p697_p8 = pnand %p406_p5, %p97_p7  ;;  %s110_s22 = sshll.u32 %s632_s21, 4  ;;  %s111_s22 = int_to_ptr.vmem [resolvable:$true] %s110_s22 }
   0xd   : > { %s707_s23 = sadd.s32 1, %s630_s12   ;;  %s633_s24 = smov 384  }
   0xe   : > { %p445_p9 = pneg %p697_p8  ;;  %s634_s25 = smov 24  }
   0xf   : > { %s23_s26 = ssub.s32 %s630_s12, %s707_s23  ;;  %s26_s27 = sadd.s32 1, %s626_s11 }
  0x10   : > { %p446_p10 = pnand %p445_p9, %p40_p1  ;;  %p24_p12 = scmp.eq.s32.totalorder %s23_s26, 0 }
  0x11   : > { %p33_p13 = scmp.ne.s32.totalorder %s626_s11, %s622_s10  ;;  %p34_p0 = scmp.eq.s32.totalorder %s630_s12, 0 }
  0x12   : > { %448 = dma.hbm_to_vmem [thread:$0]  (!%p446_p10), %s109_s19, 6144, %s111_s22, [#allocation6], %s633_s24, %s633_s24, %s634_s25  }
  0x13   : > { %p458_p3 = scmp.lt.s32.totalorder %s630_s12, 2  ;;  %p35_p5 = por %p34_p0, %p33_p13 }
  0x14   : > { %s717_s28 = scalar_select %p24_p12, %s626_s11, %s26_s27  }
  0x15   : > { %p721_p7 = por %p84_p2, %p33_p13  ;;  %s124_s30 = sand.u32 1, %s626_s11  }
  0x16   : > { %s418_s3 = sshll.u32 %s630_s12, 4  ;;  %s409_s4 = sshll.u32 %s124_s30, 4 }
  0x17   : > { %s133_s7 = scalar_lea.hbm %s799_s0, %s418_s3  ;;  %s128_s14 = scalar_lea.vmem [#allocation2], %s409_s4 }
  0x18   : > { %s134_s8 = sshll.u32 %s133_s7, 4  ;;  %s136_s17 = sshll.u32 %s128_s14, 4  ;;  %s135_s8 = int_to_ptr.hbm [resolvable:$true] %s134_s8  ;;  %s137_s17 = int_to_ptr.vmem [resolvable:$true] %s136_s17 }
  0x19   : > { %p732_p9 = pnand %p458_p3, %p35_p5  ;;  %s125_s19 = scalar_lea.sflag [#allocation3], %s124_s30 }
  0x1a   : > { %s530_s21 = sshra.s32 %s135_s8, 4  ;;  %s537_s26 = scalar_lea.hbm %s799_s0, 32  ;;  %s531_s21 = int_to_ptr.hbm [resolvable:$true] %s530_s21 }
  0x1b   : > { %s532_s22 = scalar_lea.hbm %s531_s21, 16  ;;  %p534_p10 = pneg %p732_p9 }
  0x1c   : > { %p533_p2 = scmp.ne.s32.totalorder %s531_s21, %s532_s22  ;;  %p538_p0 = scmp.lt.s32.totalorder %s531_s21, %s799_s0 }
  0x1d   : > { %p539_p3 = scmp.lt.s32.totalorder %s537_s26, %s532_s22 }
  0x1e   : > { %p535_p12 = pnand %p534_p10, %p533_p2 }
  0x1f   : > { %p540_p5 = por %p539_p3, %p538_p0 }
  0x20   : > { %p536_p13 = pneg %p535_p12 }
  0x22   : > { %p541_p11 = pnand %p540_p5, %p536_p13 }
  0x24   : > { %544 = shalt.err (!%p541_p11)
}
  0x25   : > { %s635_s30 = smov 128   ;;  %s636_s4 = smov 8  }
  0x26   : > { %452 = dma.hbm_to_vmem [thread:$0]  (!%p732_p9), %s135_s8, 256, %s137_s17, %s125_s19, %s635_s30, %s635_s30, %s636_s4  }
  0x27   : > { %148 = sbr.rel (%p697_p8) target bundleno = 223 (0xdf), region = 28  ;;  %s749_s5 = sand.u32 (!%p697_p8), 1, %s622_s10  }
  0x28   : > { %s413_s6 = sshll.u32 (!%p697_p8), %s749_s5, 4  ;;  %s151_s7 = scalar_lea.sflag (!%p697_p8), [#allocation3], %s749_s5 }
  0x29   : > { %s753_s14 = scalar_lea.vmem (!%p697_p8), [#allocation2], %s413_s6 }
  0x2c   : > { %605 = dma.done.wait (%p684_p4), %s151_s7, 256  }
  0x2d   : > { %607 = vsyncadd (%p684_p4), %s151_s7, 4294967040 }
  0x2e   : > { %609 = dma.done.wait (%p40_p1), [#allocation6], 6144  }
  0x2f   : > { %611 = vsyncadd (%p40_p1), [#allocation6], 4294961152  ;;  %v230_v0 = vld [vmem:[#allocation5 + $0x178] sm:$0xff]  ;;  %v227_v1 = vld [vmem:[#allocation5 + $0x160] sm:$0xff]  ;;  %s435_s15 = smul.u32 48, %s749_s5  ;;  %s580_s3 = scalar_lea.hbm %s801_s2, 96 }
  0x30   : > { %277 = vmatpush.msra.mxu2 %v230_v0  ;;  %v229_v2 = vld [vmem:[#allocation5 + $0x170] sm:$0xff]  ;;  %v228_v3 = vld [vmem:[#allocation5 + $0x168] sm:$0xff]  ;;  %v226_v5 = vld [vmem:[#allocation5 + $0x158] sm:$0xff]  ;;  %s436_s8 = smul.u32 48, %s675_s13  ;;  %s307_s13 = scalar_lea.sflag [#allocation4], %s749_s5 }
  0x31   : > { %v224_v4 = vld [vmem:[#allocation5 + $0x148] sm:$0xff]  ;;  %254 = vmatpush.msra.mxu1 %v229_v2  ;;  %419 = vmatpush.msra.mxu3 %v228_v3  ;;  %v225_v6 = vld [vmem:[#allocation5 + $0x150] sm:$0xff]  ;;  %v223_v7 = vld [vmem:[#allocation5 + $0x140] sm:$0xff]  ;;  %s180_s20 = scalar_lea.vmem [#allocation7], %s435_s15 }
  0x32   : > { %278 = vmatpush.msra.mxu2 %v227_v1  ;;  %v222_v8 = vld [vmem:[#allocation5 + $0x138] sm:$0xff]  ;;  %231 = vmatpush.msra.mxu0 %v228_v3  ;;  %v221_v9 = vld [vmem:[#allocation5 + $0x130] sm:$0xff]  ;;  %v220_v10 = vld [vmem:[#allocation5 + $0x128] sm:$0xff]  ;;  %s318_s19 = scalar_lea.hbm %s801_s2, %s436_s8  ;;  %s319_s21 = sshll.u32 %s180_s20, 4  ;;  %s320_s21 = int_to_ptr.vmem [resolvable:$true] %s319_s21 }
  0x33   : > { %255 = vmatpush.msra.mxu1 %v226_v5  ;;  %420 = vmatpush.msra.mxu3 %v225_v6  ;;  %v219_v11 = vld [vmem:[#allocation5 + $0x120] sm:$0xff]  ;;  %v218_v12 = vld [vmem:[#allocation5 + $0x118] sm:$0xff]  ;;  %v217_v13 = vld [vmem:[#allocation5 + $0x110] sm:$0xff]  ;;  %s321_s22 = sshll.u32 %s318_s19, 4  ;;  %s322_s22 = int_to_ptr.hbm [resolvable:$true] %s321_s22 }
  0x34   : > { %279 = vmatpush.msra.mxu2 %v224_v4  ;;  %232 = vmatpush.msra.mxu0 %v225_v6  ;;  %v216_v14 = vld [vmem:[#allocation5 + $0x108] sm:$0xff]  ;;  %v215_v15 = vld [vmem:[#allocation5 + $0x100] sm:$0xff]  ;;  %v214_v16 = vld [vmem:[#allocation5 + $0xf8] sm:$0xff]  ;;  %s574_s24 = sshra.s32 %s322_s22, 4  ;;  %s575_s24 = int_to_ptr.hbm [resolvable:$true] %s574_s24 }
  0x35   : > { %256 = vmatpush.msra.mxu1 %v223_v7  ;;  %421 = vmatpush.msra.mxu3 %v222_v8  ;;  %v213_v17 = vld [vmem:[#allocation5 + $0xf0] sm:$0xff]  ;;  %v212_v18 = vld [vmem:[#allocation5 + $0xe8] sm:$0xff]  ;;  %v211_v19 = vld [vmem:[#allocation5 + $0xe0] sm:$0xff]  ;;  %s576_s25 = scalar_lea.hbm %s575_s24, 48  ;;  %p581_p11 = scmp.lt.s32.totalorder %s575_s24, %s801_s2 }
  0x36   : > { %280 = vmatpush.msra.mxu2 %v221_v9  ;;  %233 = vmatpush.msra.mxu0 %v222_v8  ;;  %v210_v20 = vld [vmem:[#allocation5 + $0xd8] sm:$0xff]  ;;  %v209_v21 = vld [vmem:[#allocation5 + $0xd0] sm:$0xff]  ;;  %v208_v22 = vld [vmem:[#allocation5 + $0xc8] sm:$0xff]  ;;  %p577_p1 = scmp.ne.s32.totalorder %s575_s24, %s576_s25  ;;  %p582_p9 = scmp.lt.s32.totalorder %s580_s3, %s576_s25 }
  0x37   : > { %257 = vmatpush.msra.mxu1 %v220_v10  ;;  %422 = vmatpush.msra.mxu3 %v219_v11  ;;  %v207_v23 = vld [vmem:[#allocation5 + $0xc0] sm:$0xff]  ;;  %v206_v24 = vld [vmem:[#allocation5 + $0xb8] sm:$0xff]  ;;  %v205_v25 = vld [vmem:[#allocation5 + $0xb0] sm:$0xff] }
  0x38   : > { %281 = vmatpush.msra.mxu2 %v218_v12  ;;  %234 = vmatpush.msra.mxu0 %v219_v11  ;;  %v204_v26 = vld [vmem:[#allocation5 + $0xa8] sm:$0xff]  ;;  %v203_v27 = vld [vmem:[#allocation5 + $0xa0] sm:$0xff]  ;;  %v202_v28 = vld [vmem:[#allocation5 + $0x98] sm:$0xff]  ;;  %p578_p4 = pnand %p577_p1, %p721_p7  ;;  %p583_p2 = por %p582_p9, %p581_p11 }
  0x39   : > { %258 = vmatpush.msra.mxu1 %v217_v13  ;;  %423 = vmatpush.msra.mxu3 %v216_v14  ;;  %v201_v29 = vld [vmem:[#allocation5 + $0x90] sm:$0xff]  ;;  %v200_v30 = vld [vmem:[#allocation5 + $0x88] sm:$0xff]  ;;  %v199_v31 = vld [vmem:[#allocation5 + $0x80] sm:$0xff] }
  0x3a   : > { %282 = vmatpush.msra.mxu2 %v215_v15  ;;  %235 = vmatpush.msra.mxu0 %v216_v14  ;;  %v198_v32 = vld [vmem:[#allocation5 + $0x78] sm:$0xff]  ;;  %v197_v33 = vld [vmem:[#allocation5 + $0x70] sm:$0xff]  ;;  %v196_v34 = vld [vmem:[#allocation5 + $0x68] sm:$0xff]  ;;  %p579_p8 = pneg %p578_p4 }
  0x3b   : > { %259 = vmatpush.msra.mxu1 %v214_v16  ;;  %424 = vmatpush.msra.mxu3 %v213_v17  ;;  %v195_v35 = vld [vmem:[#allocation5 + $0x60] sm:$0xff]  ;;  %v194_v36 = vld [vmem:[#allocation5 + $0x58] sm:$0xff]  ;;  %v193_v37 = vld [vmem:[#allocation5 + $0x50] sm:$0xff] }
  0x3c   : > { %283 = vmatpush.msra.mxu2 %v212_v18  ;;  %236 = vmatpush.msra.mxu0 %v213_v17  ;;  %v192_v38 = vld [vmem:[#allocation5 + $0x48] sm:$0xff]  ;;  %v191_v39 = vld [vmem:[#allocation5 + $0x40] sm:$0xff]  ;;  %v190_v40 = vld [vmem:[#allocation5 + $0x38] sm:$0xff]  ;;  %p584_p10 = pnand %p583_p2, %p579_p8 }
  0x3d   : > { %260 = vmatpush.msra.mxu1 %v211_v19  ;;  %425 = vmatpush.msra.mxu3 %v210_v20  ;;  %v189_v41 = vld [vmem:[#allocation5 + $0x30] sm:$0xff]  ;;  %v188_v42 = vld [vmem:[#allocation5 + $0x28] sm:$0xff]  ;;  %v187_v43 = vld [vmem:[#allocation5 + $0x20] sm:$0xff] }
  0x3e   : > { %284 = vmatpush.msra.mxu2 %v209_v21  ;;  %237 = vmatpush.msra.mxu0 %v210_v20  ;;  %v186_v44 = vld [vmem:[#allocation5 + $0x18] sm:$0xff]  ;;  %v185_v45 = vld [vmem:[#allocation5 + $0x10] sm:$0xff]  ;;  %v184_v47 = vld [vmem:[#allocation5 + $0x8] sm:$0xff] }
  0x3f   : > { %261 = vmatpush.msra.mxu1 %v208_v22  ;;  %426 = vmatpush.msra.mxu3 %v207_v23  ;;  %v181_v46 = vld [vmem:[%s753_s14] sm:$0xff]  ;;  %v182_v49 = vld [vmem:[%s753_s14 + $0x8] sm:$0xff] }
  0x40   : > { %285 = vmatpush.msra.mxu2 %v206_v24  ;;  %238 = vmatpush.msra.mxu0 %v207_v23  ;;  %v183_v48 = vld [vmem:[#allocation5] sm:$0xff] }
  0x41   : > { %262 = vmatpush.msra.mxu1 %v205_v25  ;;  %427 = vmatpush.msra.mxu3 %v204_v26 }
  0x42   : > { %286 = vmatpush.msra.mxu2 %v203_v27  ;;  %239 = vmatpush.msra.mxu0 %v204_v26 }
  0x43   : > { %263 = vmatpush.msra.mxu1 %v202_v28  ;;  %428 = vmatpush.msra.mxu3 %v201_v29 }
  0x44   : > { %287 = vmatpush.msra.mxu2 %v200_v30  ;;  %240 = vmatpush.msra.mxu0 %v201_v29 }
  0x45   : > { %264 = vmatpush.msra.mxu1 %v199_v31  ;;  %429 = vmatpush.msra.mxu3 %v198_v32 }
  0x46   : > { %288 = vmatpush.msra.mxu2 %v197_v33  ;;  %241 = vmatpush.msra.mxu0 %v198_v32 }
  0x47   : > { %265 = vmatpush.msra.mxu1 %v196_v34  ;;  %430 = vmatpush.msra.mxu3 %v195_v35 }
  0x48   : > { %289 = vmatpush.msra.mxu2 %v194_v36  ;;  %242 = vmatpush.msra.mxu0 %v195_v35 }
  0x49   : > { %266 = vmatpush.msra.mxu1 %v193_v37  ;;  %431 = vmatpush.msra.mxu3 %v192_v38 }
  0x4a   : > { %290 = vmatpush.msra.mxu2 %v191_v39  ;;  %243 = vmatpush.msra.mxu0 %v192_v38 }
  0x4b   : > { %267 = vmatpush.msra.mxu1 %v190_v40  ;;  %432 = vmatpush.msra.mxu3 %v189_v41 }
  0x4c   : > { %291 = vmatpush.msra.mxu2 %v188_v42  ;;  %244 = vmatpush.msra.mxu0 %v189_v41 }
  0x4d   : > { %268 = vmatpush.msra.mxu1 %v187_v43  ;;  %433 = vmatpush.msra.mxu3 %v186_v44 }
  0x4e   : > { %292 = vmatpush.msra.mxu2 %v185_v45  ;;  %245 = vmatpush.msra.mxu0 %v186_v44 }
  0x4f   : > { %293 = vmatmul.f32.vlgmr.msra.gmra.mxu2 %v181_v46  ;;  %269 = vmatpush.msra.mxu1 %v184_v47 }
  0x50   : > { %270 = vmatmul.f32.vlgmr.msra.gmra.mxu1 %v181_v46  ;;  %434 = vmatpush.msra.mxu3 %v183_v48 }
  0x51   : > { %250 = vmatmul.f32.vlgmr.msra.gmra.mxu3 %v182_v49  ;;  %246 = vmatpush.msra.mxu0 %v183_v48 }
  0x52   : > { %247 = vmatmul.f32.vlgmr.msra.gmra.mxu0 %v181_v46 }
  0x57   : > { %296 = vmatmul.f32.gmra.mxu2 %v182_v49 }
  0x58   : > { %273 = vmatmul.f32.gmra.mxu1 %v182_v49 }
  0xcd   : > { %v271_v50 = vpop.f32.mrf.mxu1 }
  0xce   : > { %301 = vst [vmem:[%s180_s20 + $0x8] sm:$0xff] %v271_v50 }
  0xcf   : > { %v248_v51 = vpop.f32.mrf.mxu0 }
  0xd0   : > { %300 = vst [vmem:[%s180_s20] sm:$0xff] %v248_v51 }
  0xd2   : > { %v294_v52 = vpop.f32.mrf.mxu2 }
  0xd3   : > { %302 = vst [vmem:[%s180_s20 + $0x10] sm:$0xff] %v294_v52 }
  0xd4   : > { %v251_v53 = vpop.f32.mrf.mxu3 }
  0xd5   : > { %303 = vst [vmem:[%s180_s20 + $0x18] sm:$0xff] %v251_v53  ;;  %v274_v54 = vpop.f32.mrf.mxu1 }
  0xd6   : > { %304 = vst [vmem:[%s180_s20 + $0x20] sm:$0xff] %v274_v54 }
  0xda   : > { %v297_v55 = vpop.f32.mrf.mxu2 }
  0xdb   : > { %305 = vst [vmem:[%s180_s20 + $0x28] sm:$0xff] %v297_v55 }
  0xdc   : > { %587 = shalt.err (!%p584_p10)
}
  0xdd   : > { %s637_s5 = smov 384   ;;  %s638_s6 = smov 24  }
  0xde   : > { %443 = dma.vmem_to_hbm [thread:$0]  (%p721_p7), %s320_s21, 768, %s322_s22, %s307_s13, %s637_s5, %s637_s5, %s638_s6  }
  0xdf PF: > { %s336_s7 = sand.u32 1, %s618_s9   ;;  %p807_p12 = scmp.ge.s32.totalorder %s630_s12, 2 }
  0xe0   : > { %s337_s14 = scalar_lea.sflag [#allocation4], %s336_s7 }
  0xe1   : > { %p454_p13 = pnand %p807_p12, %p689_p6 }
  0xe3   : > { %p455_p0 = pneg %p454_p13 }
  0xe5   : > { %613 = dma.done.wait (%p455_p0), %s337_s14, 768  }
  0xe6   : > { %615 = vsyncadd (%p455_p0), %s337_s14, 4294966528  ;;  %p16_p3 = scmp.ge.s32.totalorder %s707_s23, 4   ;;  %s808_s9 = smov %s622_s10 }
  0xe7   : > { %s809_s10 = smov %s626_s11  ;;  %s810_s11 = smov %s717_s28 }
  0xe8   : > { %s811_s12 = smov %s707_s23  ;;  %18 = sbr.rel (!%p16_p3) target bundleno = 6 (0x6), region = 77 }
  0xed   :  { %343 = vsyncpa [#allocation3], 1 }
  0xee   :  { %345 = vsyncpa [#allocation3 + $0x1], 1 }
  0xef   :  { %346 = vsyncpa [#allocation6], 1 }
  0xf0   :  { %347 = vsyncpa [#allocation4], 1 }
  0xf1   :  { %349 = vsyncpa [#allocation4 + $0x1], 1 }

</bundles_post_ra>
